<compile_context>
chip_gen: v5e
topology: v5e:2x2
jax: 0.10.0
libtpu: 0.0.40
codegen_flags: <defaults>
</compile_context>

<pallas_src>
import jax
import jax.numpy as jnp
from jax.experimental import pallas as pl
from jax.experimental.pallas import tpu as pltpu


def _sum_add_kernel(x_ref, y_ref, o_ref):
    # x_ref: (2,) f32 in SMEM; y_ref / o_ref: (1, 6) f32 in VMEM (aliased).
    n = x_ref.shape[0]
    s = x_ref[0]
    for i in range(1, n):          # statically unrolled scalar-ALU adds
        s = s + x_ref[i]
    o_ref[...] = y_ref[...] + s    # broadcast add onto flattened y


def _foo_is_scalar(shape):
    # Mirrors Model.foo's branch: shape[0] == 1 -> scalar sum, else flatten.
    return shape[0] == 1


@jax.jit
def model_forward(x, y):
    """JAX/Pallas equivalent of Model.forward for x:(1,2), y:(2,3)."""
    assert _foo_is_scalar(x.shape) and not _foo_is_scalar(y.shape), (
        "This kernel implements the branch taken by the reference inputs: "
        "x.shape[0] == 1 (scalar sum) and y.shape[0] != 1 (flatten)."
    )
    # Glue (wrapper-side, pure XLA layout): x -> 1-D for SMEM, y -> lane-major row.
    x_flat = x.reshape(-1)        # (2,)
    y_flat = y.reshape(1, -1)     # (1, 6)

    out = pl.pallas_call(
        _sum_add_kernel,
        out_shape=jax.ShapeDtypeStruct(y_flat.shape, y.dtype),
        in_specs=[
            pl.BlockSpec(memory_space=pltpu.MemorySpace.SMEM),   # x scalars
            pl.BlockSpec(memory_space=pltpu.MemorySpace.VMEM),   # y row
        ],
        out_specs=pl.BlockSpec(memory_space=pltpu.MemorySpace.VMEM),
        input_output_aliases={1: 0},   # write result in place over y_flat
        cost_estimate=pl.CostEstimate(
            flops=8, transcendentals=0, bytes_accessed=56
        ),
    )(x_flat, y_flat)

    # forward returns foo(x) + foo(y) == scalar + (6,) -> (6,)
    return out.reshape(-1)


if __name__ == "__main__":
    key = jax.random.PRNGKey(0)
    kx, ky = jax.random.split(key)
    x = jax.random.normal(kx, (1, 2), dtype=jnp.float32)
    y = jax.random.normal(ky, (2, 3), dtype=jnp.float32)

    result = model_forward(x, y)
    jax.block_until_ready(result)

    # Reference check against plain JAX semantics of the PyTorch module.
    ref = jnp.sum(x) + y.reshape(-1)
    assert result.shape == (6,), result.shape
    assert jnp.allclose(result, ref, atol=1e-6, rtol=1e-6), (result, ref)

    print("KERNEL_OK")
</pallas_src>

<mosaic_0001>
module attributes {stable_mosaic.version = 11 : i64} {
  func.func @_sum_add_kernel(%arg0: memref<2xf32, #tpu.memory_space<smem>>, %arg1: memref<1x6xf32, #tpu.memory_space<vmem>>, %arg2: memref<1x6xf32, #tpu.memory_space<vmem>>) attributes {dimension_semantics = [], scalar_prefetch = 0 : i64, scratch_operands = 0 : i64, tpu.core_type = #tpu.core_type<tc>} {
    %c0 = arith.constant 0 : index
    %0 = memref.load %arg0[%c0] : memref<2xf32, #tpu.memory_space<smem>>
    %c1 = arith.constant 1 : index
    %1 = memref.load %arg0[%c1] : memref<2xf32, #tpu.memory_space<smem>>
    %2 = arith.addf %0, %1 : f32
    %c0_0 = arith.constant 0 : index
    %c0_1 = arith.constant 0 : index
    %3 = vector.load %arg1[%c0_0, %c0_1] : memref<1x6xf32, #tpu.memory_space<vmem>>, vector<1x6xf32>
    %4 = vector.broadcast %2 : f32 to vector<1x6xf32>
    %5 = arith.addf %3, %4 : vector<1x6xf32>
    %c0_2 = arith.constant 0 : index
    %c0_3 = arith.constant 0 : index
    %6 = vector.load %arg2[%c0_2, %c0_3] : memref<1x6xf32, #tpu.memory_space<vmem>>, vector<1x6xf32>
    tpu.vector_store %arg2[%c0_2, %c0_3], %5 {strides = array<i32>} : memref<1x6xf32, #tpu.memory_space<vmem>>, vector<1x6xf32>,
    return
  }
}

</mosaic_0001>

<bundles_post_ra>
// kernel: model_forward.1
= control target key start
LH: loop header
LB: loop body
LE: loop exit
PB: predicated region body
PF: predicated region fallthrough
CT: control target
= control target key end

     0   :  { %7 = vsyncpa [#allocation3], 0  ;;  %s53_s12 = smov [#allocation2]   ;;  %s78_s0 = inlined_call_operand.vmem [shape: f32[2], index: 0, kind: input, shape index: {}]   ;;  %s79_s1 = inlined_call_operand.vmem [shape: f32[1,6], index: 1, kind: input, shape index: {}, may-alias: {1,2}]   ;;  %s80_s2 = inlined_call_operand.vmem [shape: f32[1,6], index: 2, kind: output, shape index: {}, may-alias: {1,2}]  }
   0x1   :  { %s13_s11 = sshll.u32 %s78_s0, 4  ;;  %s14_s11 = int_to_ptr.vmem [resolvable:$true] %s13_s11 }
   0x2   :  { %16 = dma.vmem_to_smem %s14_s11, 16, %s53_s12, [#allocation3]  }
   0x3   :  { %51 = dma.done.wait [#allocation3], 16  }
   0x4   :  { %52 = vsyncadd [#allocation3], 4294967280 }
   0x5   :  { %23 = sfence }
   0x6   :  { %s24_s13 = sld [smem:[#allocation2]]  ;;  %v27_v0 = vld [vmem:[%s79_s1] sm:$0x1]  ;;  %vm30_vm0 = vcmask 40960  }
   0x7   :  { %s37_s14 = sld [smem:[#allocation2 + $0x1]] }
   0xd   :  { %s26_s15 = sadd.f32 %s37_s14, %s24_s13 }
   0xf   :  { %v28_v1 = vstv %s26_s15 }
  0x10   :  { %v29_v2 = vadd.f32 %v28_v1, %v27_v0 }
  0x12   :  { %31 = vst.msk [vmem:[%s80_s2] sm:$0x1] %vm30_vm0, %v29_v2 }
  0x13   :  { %36 = vsyncpa [#allocation3], 1 }

</bundles_post_ra>
